<compile_context>
chip_gen: v6e
topology: v6e:2x2x1
jax: 0.10.0
libtpu: 0.0.40
codegen_flags: <defaults>
</compile_context>

<pallas_src>
import functools

import jax
import jax.numpy as jnp
from jax.experimental import pallas as pl
from jax.experimental.pallas import tpu as pltpu


def _round_up(x, m):
    return ((x + m - 1) // m) * m


# ----------------------------------------------------------------------------
# Kernel A: channels-major ('BCNM' / 'BCN').  Tile is (C, tn) with tokens on
# the lane axis.  refs = (w_0, shift_0, w_1, shift_1, ..., o_ref).
# ----------------------------------------------------------------------------
def _fused_mlps_cmajor_kernel(x_ref, *refs, relu_flags):
    o_ref = refs[-1]
    param_refs = refs[:-1]

    h = x_ref[0].astype(jnp.float32)                       # (C_in, tn)
    for li, do_relu in enumerate(relu_flags):
        w = param_refs[2 * li][...]                        # (c_out, c_in)
        s = param_refs[2 * li + 1][...]                    # (c_out, 1)
        h = jnp.dot(w, h, preferred_element_type=jnp.float32) + s
        if do_relu:
            h = jnp.maximum(h, 0.0)
    o_ref[0] = h.astype(o_ref.dtype)


def _run_fused_cmajor(x_cm, fused_params, relu_flags, *, tn=1024):
    """x_cm: (B, C0, T) f32; fused_params: [(W_i (co,ci), shift_i (co,1)), ...]."""
    B, C0, T = x_cm.shape
    c_last = fused_params[-1][0].shape[0]

    tn_eff = min(tn, _round_up(max(T, 1), 128))            # lane-dense tile
    T_pad = _round_up(T, tn_eff)
    if T_pad != T:
        x_cm = jnp.pad(x_cm, ((0, 0), (0, 0), (0, T_pad - T)))

    grid = (B, T_pad // tn_eff)

    in_specs = [pl.BlockSpec((1, C0, tn_eff), lambda b, t: (b, 0, t))]
    flat_inputs = [x_cm]
    for (w, s) in fused_params:
        co, ci = w.shape
        in_specs.append(pl.BlockSpec((co, ci), lambda b, t: (0, 0)))   # resident weight
        in_specs.append(pl.BlockSpec((co, 1), lambda b, t: (0, 0)))    # resident shift
        flat_inputs.append(w)
        flat_inputs.append(s)

    kernel = functools.partial(_fused_mlps_cmajor_kernel, relu_flags=tuple(relu_flags))

    out = pl.pallas_call(
        kernel,
        out_shape=jax.ShapeDtypeStruct((B, c_last, T_pad), jnp.float32),
        grid_spec=pltpu.PrefetchScalarGridSpec(
            num_scalar_prefetch=0,
            grid=grid,
            in_specs=in_specs,
            out_specs=pl.BlockSpec((1, c_last, tn_eff), lambda b, t: (b, 0, t)),
        ),
        compiler_params=pltpu.CompilerParams(
            dimension_semantics=("parallel", "parallel")),
    )(*flat_inputs)

    if T_pad != T:
        out = out[:, :, :T]
    return out


# ----------------------------------------------------------------------------
# Kernel B: channels-last ('BNC').  Tile is (tm, C) with tokens on sublanes.
# refs = (w_0, shift_0, w_1, shift_1, ..., o_ref).
# ----------------------------------------------------------------------------
def _fused_mlps_rowmajor_kernel(x_ref, *refs, relu_flags):
    o_ref = refs[-1]
    param_refs = refs[:-1]

    h = x_ref[...].astype(jnp.float32)                     # (tm, C_in)
    for li, do_relu in enumerate(relu_flags):
        w = param_refs[2 * li][...]                        # (c_in, c_out)
        s = param_refs[2 * li + 1][...]                    # (1, c_out)
        h = jnp.dot(h, w, preferred_element_type=jnp.float32) + s
        if do_relu:
            h = jnp.maximum(h, 0.0)
    o_ref[...] = h.astype(o_ref.dtype)


def _run_fused_rowmajor(x_tok, fused_params, relu_flags, *, tm=1024):
    """x_tok: (T, C0) f32; fused_params: [(W_i (ci,co), shift_i (1,co)), ...]."""
    T, C0 = x_tok.shape
    c_last = fused_params[-1][0].shape[1]

    tm_eff = min(tm, _round_up(max(T, 1), 8))
    T_pad = _round_up(T, tm_eff)
    if T_pad != T:
        x_tok = jnp.pad(x_tok, ((0, T_pad - T), (0, 0)))

    grid = (T_pad // tm_eff,)

    in_specs = [pl.BlockSpec((tm_eff, C0), lambda i: (i, 0))]
    flat_inputs = [x_tok]
    for (w, s) in fused_params:
        ci, co = w.shape
        in_specs.append(pl.BlockSpec((ci, co), lambda i: (0, 0)))
        in_specs.append(pl.BlockSpec((1, co), lambda i: (0, 0)))
        flat_inputs.append(w)
        flat_inputs.append(s)

    kernel = functools.partial(_fused_mlps_rowmajor_kernel, relu_flags=tuple(relu_flags))

    out = pl.pallas_call(
        kernel,
        out_shape=jax.ShapeDtypeStruct((T_pad, c_last), jnp.float32),
        grid_spec=pltpu.PrefetchScalarGridSpec(
            num_scalar_prefetch=0,
            grid=grid,
            in_specs=in_specs,
            out_specs=pl.BlockSpec((tm_eff, c_last), lambda i: (i, 0)),
        ),
        compiler_params=pltpu.CompilerParams(
            dimension_semantics=("parallel",)),
    )(*flat_inputs)

    if T_pad != T:
        out = out[:T]
    return out


# ----------------------------------------------------------------------------
# Module
# ----------------------------------------------------------------------------
class MlpsPallas:
    """JAX/Pallas port of models/nn_pts.py::Mlps (inference-mode BN)."""

    def __init__(self, inc, outc_list=(128,), last_bn_norm=True, *, key=None):
        assert len(outc_list) > 0
        if key is None:
            key = jax.random.PRNGKey(0)
        eps = 1e-5

        self.ref_params = []        # (w (ci,co), b, scale, shift, has_bn_relu)  -- reference
        self.fused_row = []         # (W (ci_pad, co_pad), shift (1, co_pad))    -- BNC kernel
        self.fused_cm = []          # (W (co_pad, ci_pad), shift (co_pad, 1))    -- BCNM/BCN kernel
        self.relu_flags = []

        n_layers = len(outc_list)
        c_in = inc
        c_in_pad_row = inc          # row-major chain (lanes): pad intermediates to 128
        c_in_pad_cm = inc           # channels-major chain (sublanes): pad intermediates to 8
        for i, c_out in enumerate(outc_list):
            key, kw, kb = jax.random.split(key, 3)
            # Conv2d(inc, outc, 1) weight (outc, inc, 1, 1) stored here as (inc, outc).
            bound = 1.0 / (float(c_in) ** 0.5)
            w = jax.random.uniform(kw, (c_in, c_out), jnp.float32, -bound, bound)
            b = jax.random.uniform(kb, (c_out,), jnp.float32, -bound, bound)

            has_bn_relu = (i + 1 < n_layers) or last_bn_norm
            if has_bn_relu:
                # BatchNorm2d defaults: gamma=1, beta=0, running_mean=0, running_var=1.
                gamma = jnp.ones((c_out,), jnp.float32)
                beta = jnp.zeros((c_out,), jnp.float32)
                r_mean = jnp.zeros((c_out,), jnp.float32)
                r_var = jnp.ones((c_out,), jnp.float32)
                scale = gamma / jnp.sqrt(r_var + eps)
                shift = beta - r_mean * scale
            else:
                scale = jnp.ones((c_out,), jnp.float32)
                shift = jnp.zeros((c_out,), jnp.float32)

            self.ref_params.append((w, b, scale, shift, has_bn_relu))
            self.relu_flags.append(has_bn_relu)

            # Fold conv bias + BN into weight / shift.
            w_fold = w * scale[None, :]                     # (c_in, c_out)
            shift_fold = b * scale + shift                  # (c_out,)

            is_last = (i == n_layers - 1)

            # ---- row-major (BNC) params: channels on lanes -> pad to 128 ----
            co_pad_row = c_out if is_last else _round_up(c_out, 128)
            w_row = jnp.zeros((c_in_pad_row, co_pad_row), jnp.float32)
            w_row = w_row.at[:c_in, :c_out].set(w_fold)
            s_row = jnp.zeros((1, co_pad_row), jnp.float32)
            s_row = s_row.at[0, :c_out].set(shift_fold)
            self.fused_row.append((w_row, s_row))

            # ---- channels-major (BCNM/BCN) params: channels on sublanes -> pad to 8 ----
            co_pad_cm = c_out if is_last else _round_up(c_out, 8)
            w_cm = jnp.zeros((co_pad_cm, c_in_pad_cm), jnp.float32)
            w_cm = w_cm.at[:c_out, :c_in].set(w_fold.T)
            s_cm = jnp.zeros((co_pad_cm, 1), jnp.float32)
            s_cm = s_cm.at[:c_out, 0].set(shift_fold)
            self.fused_cm.append((w_cm, s_cm))

            c_in = c_out
            c_in_pad_row = co_pad_row
            c_in_pad_cm = co_pad_cm

    def __call__(self, x, format='BCNM'):
        assert format in ['BNC', 'BCNM', 'BCN']
        if format == 'BNC':
            # channels-last: tokens-as-rows kernel, zero transposes.
            B, N, C = x.shape
            x_tok = x.reshape(B * N, C)
            y_tok = _run_fused_rowmajor(x_tok, self.fused_row, self.relu_flags)
            return y_tok.reshape(B, N, y_tok.shape[-1])
        elif format == 'BCN':
            # channels-major: work directly on (B, C, N), zero transposes.
            y = _run_fused_cmajor(x, self.fused_cm, self.relu_flags)
            return y
        else:  # 'BCNM'
            B, C, N, M = x.shape
            x_cm = x.reshape(B, C, N * M)                   # free reshape
            y = _run_fused_cmajor(x_cm, self.fused_cm, self.relu_flags)
            return y.reshape(B, y.shape[1], N, M)


# ----------------------------------------------------------------------------
# Plain-JAX reference (unfused, unpadded params) for correctness checking.
# ----------------------------------------------------------------------------
def _reference(x, model, format='BCNM'):
    if format == 'BNC':
        x = jnp.transpose(x, (0, 2, 1))[..., None]
    elif format == 'BCN':
        x = x[..., None]
    B, C, N, M = x.shape
    h = jnp.transpose(x, (0, 2, 3, 1)).reshape(-1, C)
    for (w, b, scale, shift, has_bn_relu) in model.ref_params:
        h = h @ w + b
        if has_bn_relu:
            h = jnp.maximum(h * scale + shift, 0.0)
    y = h.reshape(B, N, M, -1).transpose(0, 3, 1, 2)
    if format == 'BNC':
        y = jnp.transpose(y[..., 0], (0, 2, 1))
    elif format == 'BCN':
        y = y[..., 0]
    return y


if __name__ == "__main__":
    key = jax.random.PRNGKey(0)
    k_x, k_p, k_x2, k_p2, k_x3, k_p3 = jax.random.split(key, 6)

    # --- check 1: BCNM, BN+ReLU on every layer (channels-major kernel) ----
    B, C, N, M = 2, 4, 16, 16
    x = jax.random.normal(k_x, (B, C, N, M), jnp.float32)
    model = MlpsPallas(inc=C, outc_list=(32, 64), last_bn_norm=True, key=k_p)
    y = jax.block_until_ready(model(x, format='BCNM'))
    assert y.shape == (B, 64, N, M), y.shape
    y_ref = _reference(x, model, format='BCNM')
    assert jnp.allclose(y, y_ref, atol=1e-4, rtol=1e-4), "mismatch vs reference (BCNM)"

    # --- check 2: BNC format, no BN/ReLU on the last layer (row-major kernel)
    B2, N2, C2 = 2, 24, 4
    x2 = jax.random.normal(k_x2, (B2, N2, C2), jnp.float32)
    model2 = MlpsPallas(inc=C2, outc_list=(32, 16), last_bn_norm=False, key=k_p2)
    y2 = jax.block_until_ready(model2(x2, format='BNC'))
    assert y2.shape == (B2, N2, 16), y2.shape
    y2_ref = _reference(x2, model2, format='BNC')
    assert jnp.allclose(y2, y2_ref, atol=1e-4, rtol=1e-4), "mismatch vs reference (BNC)"

    # --- check 3: BCN format, small token count (exercises token padding) --
    B3, C3, N3 = 2, 4, 16
    x3 = jax.random.normal(k_x3, (B3, C3, N3), jnp.float32)
    model3 = MlpsPallas(inc=C3, outc_list=(32,), last_bn_norm=True, key=k_p3)
    y3 = jax.block_until_ready(model3(x3, format='BCN'))
    assert y3.shape == (B3, 32, N3), y3.shape
    y3_ref = _reference(x3, model3, format='BCN')
    assert jnp.allclose(y3, y3_ref, atol=1e-4, rtol=1e-4), "mismatch vs reference (BCN)"

    print("KERNEL_OK")
</pallas_src>

<mosaic_0001>
module attributes {stable_mosaic.version = 11 : i64} {
  func.func @_fused_mlps_cmajor_kernel(%arg0: i32, %arg1: i32, %arg2: memref<1x4x256xf32, #tpu.memory_space<vmem>>, %arg3: memref<32x4xf32, #tpu.memory_space<vmem>>, %arg4: memref<32x1xf32, #tpu.memory_space<vmem>>, %arg5: memref<64x32xf32, #tpu.memory_space<vmem>>, %arg6: memref<64x1xf32, #tpu.memory_space<vmem>>, %arg7: memref<1x64x256xf32, #tpu.memory_space<vmem>>) attributes {dimension_semantics = [#tpu.dimension_semantics<parallel>, #tpu.dimension_semantics<parallel>], iteration_bounds = array<i64: 2, 1>, scalar_prefetch = 0 : i64, scratch_operands = 0 : i64, tpu.core_type = #tpu.core_type<tc>, window_params = [{transform_indices = @transform_0, window_bounds = array<i64: 1, 4, 256>}, {pipeline_mode = #tpu.pipeline_mode<synchronous>, transform_indices = @transform_1, window_bounds = array<i64: 32, 4>}, {pipeline_mode = #tpu.pipeline_mode<synchronous>, transform_indices = @transform_2, window_bounds = array<i64: 32, 1>}, {pipeline_mode = #tpu.pipeline_mode<synchronous>, transform_indices = @transform_3, window_bounds = array<i64: 64, 32>}, {pipeline_mode = #tpu.pipeline_mode<synchronous>, transform_indices = @transform_4, window_bounds = array<i64: 64, 1>}, {transform_indices = @transform_5, window_bounds = array<i64: 1, 64, 256>}]} {
    %c0 = arith.constant 0 : index
    %c0_0 = arith.constant 0 : index
    %c0_1 = arith.constant 0 : index
    %0 = vector.load %arg2[%c0, %c0_0, %c0_1] : memref<1x4x256xf32, #tpu.memory_space<vmem>>, vector<1x4x256xf32>
    %1 = vector.shape_cast %0 : vector<1x4x256xf32> to vector<4x256xf32>
    %c0_2 = arith.constant 0 : index
    %c0_3 = arith.constant 0 : index
    %2 = vector.load %arg3[%c0_2, %c0_3] : memref<32x4xf32, #tpu.memory_space<vmem>>, vector<32x4xf32>
    %c0_4 = arith.constant 0 : index
    %c0_5 = arith.constant 0 : index
    %3 = vector.load %arg4[%c0_4, %c0_5] : memref<32x1xf32, #tpu.memory_space<vmem>>, vector<32x1xf32>
    %cst = arith.constant dense<0.000000e+00> : vector<32x256xf32>
    %4 = tpu.matmul %2, %1, %cst {dimension_numbers = #tpu.dot_dimension_numbers<[1], [0], [0], [1], [0, 0, 1, 1], [], []>} : vector<32x4xf32>, vector<4x256xf32>, vector<32x256xf32> -> vector<32x256xf32>
    %5 = vector.broadcast %3 : vector<32x1xf32> to vector<32x256xf32>
    %6 = arith.addf %4, %5 : vector<32x256xf32>
    %cst_6 = arith.constant 0.000000e+00 : f32
    %7 = vector.broadcast %cst_6 : f32 to vector<32x256xf32>
    %8 = arith.maximumf %6, %7 : vector<32x256xf32>
    %c0_7 = arith.constant 0 : index
    %c0_8 = arith.constant 0 : index
    %9 = vector.load %arg5[%c0_7, %c0_8] : memref<64x32xf32, #tpu.memory_space<vmem>>, vector<64x32xf32>
    %c0_9 = arith.constant 0 : index
    %c0_10 = arith.constant 0 : index
    %10 = vector.load %arg6[%c0_9, %c0_10] : memref<64x1xf32, #tpu.memory_space<vmem>>, vector<64x1xf32>
    %cst_11 = arith.constant dense<0.000000e+00> : vector<64x256xf32>
    %11 = tpu.matmul %9, %8, %cst_11 {dimension_numbers = #tpu.dot_dimension_numbers<[1], [0], [0], [1], [0, 0, 1, 1], [], []>} : vector<64x32xf32>, vector<32x256xf32>, vector<64x256xf32> -> vector<64x256xf32>
    %12 = vector.broadcast %10 : vector<64x1xf32> to vector<64x256xf32>
    %13 = arith.addf %11, %12 : vector<64x256xf32>
    %cst_12 = arith.constant 0.000000e+00 : f32
    %14 = vector.broadcast %cst_12 : f32 to vector<64x256xf32>
    %15 = arith.maximumf %13, %14 : vector<64x256xf32>
    %c0_13 = arith.constant 0 : index
    %c0_14 = arith.constant 0 : index
    %c0_15 = arith.constant 0 : index
    %16 = vector.load %arg7[%c0_13, %c0_14, %c0_15] : memref<1x64x256xf32, #tpu.memory_space<vmem>>, vector<1x64x256xf32>
    %17 = vector.shape_cast %16 : vector<1x64x256xf32> to vector<64x256xf32>
    %18 = vector.shape_cast %15 : vector<64x256xf32> to vector<1x64x256xf32>
    tpu.vector_store %arg7[%c0_13, %c0_14, %c0_15], %18 {strides = array<i32>} : memref<1x64x256xf32, #tpu.memory_space<vmem>>, vector<1x64x256xf32>,
    return
  }
  func.func @transform_0(%arg0: i32, %arg1: i32) -> (i32, i32, i32) {
    %c0_i32 = arith.constant 0 : i32
    %c0_i32_0 = arith.constant 0 : i32
    return %arg0, %c0_i32, %arg1 : i32, i32, i32
  }
  func.func @transform_1(%arg0: i32, %arg1: i32) -> (i32, i32) {
    %c0_i32 = arith.constant 0 : i32
    %c0_i32_0 = arith.constant 0 : i32
    %c0_i32_1 = arith.constant 0 : i32
    return %c0_i32, %c0_i32_0 : i32, i32
  }
  func.func @transform_2(%arg0: i32, %arg1: i32) -> (i32, i32) {
    %c0_i32 = arith.constant 0 : i32
    %c0_i32_0 = arith.constant 0 : i32
    %c0_i32_1 = arith.constant 0 : i32
    return %c0_i32, %c0_i32_0 : i32, i32
  }
  func.func @transform_3(%arg0: i32, %arg1: i32) -> (i32, i32) {
    %c0_i32 = arith.constant 0 : i32
    %c0_i32_0 = arith.constant 0 : i32
    %c0_i32_1 = arith.constant 0 : i32
    return %c0_i32, %c0_i32_0 : i32, i32
  }
  func.func @transform_4(%arg0: i32, %arg1: i32) -> (i32, i32) {
    %c0_i32 = arith.constant 0 : i32
    %c0_i32_0 = arith.constant 0 : i32
    %c0_i32_1 = arith.constant 0 : i32
    return %c0_i32, %c0_i32_0 : i32, i32
  }
  func.func @transform_5(%arg0: i32, %arg1: i32) -> (i32, i32, i32) {
    %c0_i32 = arith.constant 0 : i32
    %c0_i32_0 = arith.constant 0 : i32
    return %arg0, %c0_i32, %arg1 : i32, i32, i32
  }
}

</mosaic_0001>

<bundles_post_ra>
// kernel: tpu_custom_call.1
= control target key start
LH: loop header
LB: loop body
LE: loop exit
PB: predicated region body
PF: predicated region fallthrough
CT: control target
= control target key end

     0   :  { %10 = vsyncpa [#allocation3], 0  ;;  %s1166_s0 = inlined_call_operand.vmem [shape: f32[2,4,256], index: 0, kind: input, shape index: {}]   ;;  %s1167_s1 = inlined_call_operand.vmem [shape: f32[32,4], index: 1, kind: input, shape index: {}]   ;;  %s1168_s2 = inlined_call_operand.vmem [shape: f32[32,1], index: 2, kind: input, shape index: {}]   ;;  %s1169_s3 = inlined_call_operand.vmem [shape: f32[64,32], index: 3, kind: input, shape index: {}]   ;;  %s1170_s4 = inlined_call_operand.vmem [shape: f32[64,1], index: 4, kind: input, shape index: {}]   ;;  %s1171_s5 = inlined_call_operand.hbm [shape: f32[2,64,256], index: 5, kind: output, shape index: {}]  }
   0x1   :  { %12 = vsyncpa [#allocation3 + $0x1], 0  ;;  %s933_s18 = smov 0   ;;  %s935_s19 = smov 0  }
   0x2   :  { %s937_s20 = smov 0   ;;  %s939_s21 = smov 0  }
   0x3   :  { %s941_s22 = smov 0   ;;  %s943_s23 = smov 0  }
   0x4 LB: > { %s721_s24 = sadd.s32 4294967295, %s896_s23   ;;  %s722_s25 = sadd.s32 4294967294, %s896_s23   ;;  %s896_s23 = sphi %s943_s23, %s18_s23   ;;  %s892_s22 = sphi %s941_s22, %s1178_s22   ;;  %s888_s21 = sphi %s939_s21, %s1177_s21   ;;  %s884_s20 = sphi %s937_s20, %s1176_s20   ;;  %s880_s19 = sphi %s935_s19, %s1175_s19   ;;  %s876_s18 = sphi %s933_s18, %s1174_s18  }
   0x5   : > { %s30_s26 = sadd.s32 1, %s892_s22  ;;  %s151_s27 = sadd.s32 1, %s884_s20 }
   0x6   : > { %p32_p0 = scmp.ge.s32.totalorder %s30_s26, 2  ;;  %p161_p1 = scmp.ne.s32.totalorder %s884_s20, %s880_s19 }
   0x7   : > { %p162_p2 = scmp.eq.s32.totalorder %s721_s24, 1  ;;  %p167_p3 = scmp.ne.s32.totalorder %s880_s19, %s876_s18 }
   0x8   : > { %s1180_s26 = smov (%p32_p0, %s30_s26), 0  ;;  %p168_p5 = scmp.eq.s32.totalorder %s722_s25, 1 }
   0x9   : > { %p973_p4 = por %p162_p2, %p161_p1  ;;  %s146_s29 = ssub.s32 %s892_s22, %s1180_s26 }
   0xa   : > { %p725_p6 = scmp.ge.s32.totalorder %s896_s23, 1  ;;  %p149_p7 = scmp.eq.s32.totalorder %s146_s29, 0 }
   0xb   : > { %p980_p8 = por %p168_p5, %p167_p3  ;;  %p211_p9 = scmp.lt.s32.totalorder %s896_s23, 3 }
   0xc   : > { %s986_s6 = scalar_select %p149_p7, %s884_s20, %s151_s27  }
   0xd   : > { %p212_p10 = pnand %p725_p6, %p211_p9 }
   0xe   : > { %p244_p11 = scmp.lt.s32.totalorder (!%p212_p10), %s888_s21, 1  ;;  %s240_s15 = sand.u32 (!%p212_p10), 1, %s880_s19  }
   0xf   : > { %215 = sbr.rel (%p212_p10) target bundleno = 482 (0x1e2), region = 40  ;;  %s726_s16 = sshll.u32 (!%p212_p10), %s240_s15, 7 }
  0x10   : > { %s1092_s17 = scalar_lea.vmem (!%p212_p10), [#allocation2], %s726_s16  ;;  %s749_s24 = sshll.u32 (!%p212_p10), %s888_s21, 11 }
  0x11   : > { %s1113_s7 = scalar_lea.hbm (!%p212_p10), %s1171_s5, %s749_s24 }
  0x14   : > { %v898_v0 = vmov 0.0   ;;  %v262_v1 = vld [vmem:[%s1168_s2 + $0x18] sm:$0xff]  ;;  %s245_s9 = scalar_select %p244_p11, %s888_s21, 1  ;;  %v899_v2 = vmov 0   ;;  %v260_v3 = vld [vmem:[%s1168_s2 + $0x8] sm:$0xff]  ;;  %v261_v4 = vld [vmem:[%s1168_s2 + $0x10] sm:$0xff] }
  0x15   : > { %367 = vmatprep.mubr.f32.mxu0 %v898_v0  ;;  %557 = vmatprep.mubr.f32.mxu1 %v898_v0  ;;  %v259_v5 = vld [vmem:[%s1168_s2] sm:$0xff]  ;;  %vm298_vm0 = vcmask 1043456   ;;  %vm285_vm1 = vcmask 31744   ;;  %v409_v10 = vld [vmem:[%s1170_s4 + $0x8] sm:$0xff]  ;;  %v410_v12 = vld [vmem:[%s1170_s4 + $0x10] sm:$0xff]  ;;  %vm456_vm2 = vcmask 261120  }
  0x16   : > { %817 = vset.pattern.permute.xlu0 %v899_v2  ;;  %818 = vset.pattern.permute.xlu1 %v899_v2  ;;  %s748_s12 = sshll.u32 %s245_s9, 3  ;;  %v255_v8 = vld [vmem:[%s1167_s1] sm:$0xff]  ;;  %v256_v11 = vld [vmem:[%s1167_s1 + $0x8] sm:$0xff]  ;;  %v411_v13 = vld [vmem:[%s1170_s4 + $0x18] sm:$0xff]  ;;  %s1121_s21 = scalar_lea.sflag [#allocation3], %s240_s15 }
  0x17   : > { %280 = vperm.xlu0 %817, %v262_v1   ;;  %270 = vperm.xlu1 %818, %v260_v3   ;;  %s251_s25 = scalar_lea.vmem %s1166_s0, %s748_s12  ;;  %v408_v9 = vld [vmem:[%s1170_s4] sm:$0xff]  ;;  %v257_v14 = vld [vmem:[%s1167_s1 + $0x10] sm:$0xff]  ;;  %v413_v16 = vld [vmem:[%s1170_s4 + $0x28] sm:$0xff]  ;;  %s900_s9 = smov [#allocation2]  }
  0x18   : > { %v254_v6 = vld [vmem:[%s251_s25] sm:$0xff]  ;;  %v258_v17 = vld [vmem:[%s1167_s1 + $0x18] sm:$0xff]  ;;  %v414_v18 = vld [vmem:[%s1170_s4 + $0x30] sm:$0xff]  ;;  %s642_s25 = sshll.u32 %s1092_s17, 4  ;;  %s824_s10 = sshll.u32 %s900_s9, 4  ;;  %s1115_s25 = int_to_ptr.vmem [resolvable:$true] %s642_s25  ;;  %s825_s10 = int_to_ptr.vmem [resolvable:$false] %s824_s10 }
  0x19   : > { %v284_v7 = vcombine.high %v254_v6, %v254_v6  ;;  %v412_v15 = vld [vmem:[%s1170_s4 + $0x20] sm:$0xff]  ;;  %v415_v19 = vld [vmem:[%s1170_s4 + $0x38] sm:$0xff]  ;;  %v402_v49 = vld [vmem:[%s1169_s3 + $0x10] sm:$0xff]  ;;  %s820_s8 = scalar_lea.vmem %s1115_s25, 2048  ;;  %s826_s11 = scalar_lea.vmem %s825_s10, 4096 }
  0x1a   : > { %v400_v48 = vld [vmem:[%s1169_s3] sm:$0xff]  ;;  %v401_v50 = vld [vmem:[%s1169_s3 + $0x8] sm:$0xff]  ;;  %v403_v51 = vld [vmem:[%s1169_s3 + $0x18] sm:$0xff]  ;;  %p821_p12 = scmp.ne.s32.totalorder %s1115_s25, %s820_s8  ;;  %p827_p1 = scmp.lt.s32.totalorder %s1115_s25, %s825_s10 }
  0x1b   : > { %275 = vperm.xlu0 %817, %v261_v4   ;;  %265 = vperm.xlu1 %818, %v259_v5   ;;  %v404_v52 = vld [vmem:[%s1169_s3 + $0x20] sm:$0xff]  ;;  %v405_v53 = vld [vmem:[%s1169_s3 + $0x28] sm:$0xff]  ;;  %v406_v54 = vld [vmem:[%s1169_s3 + $0x30] sm:$0xff]  ;;  %p828_p2 = scmp.lt.s32.totalorder %s826_s11, %s820_s8 }
  0x1c   : > { %729 = vmatprep.subr.msk.mxu0 %vm298_vm0, %v284_v7  ;;  %v407_v55 = vld [vmem:[%s1169_s3 + $0x38] sm:$0xff]  ;;  %p822_p13 = pnand %p821_p12, %p973_p4 }
  0x1d   : > { %730 = vmatpush1.msk.msra.mxu0 %vm298_vm0, %v254_v6  ;;  %p829_p3 = por %p828_p2, %p827_p1 }
  0x1e   : > { %731 = vmatmul.mubr.msk.f32.vlgmr.msra.gmra.mxu0 %vm285_vm1, %v255_v8  ;;  %p823_p0 = pneg %p822_p13 }
  0x1f   : > { %418 = vperm.xlu0 %817, %v408_v9   ;;  %373 = vmatprep.mubr.f32.mxu0 %v898_v0 }
  0x20   : > { %423 = vperm.xlu1 %818, %v409_v10   ;;  %p830_p5 = pnand %p829_p3, %p823_p0 }
  0x22   : > { %732 = vmatmul.mubr.msk.f32.gmra.mxu0 %vm285_vm1, %v256_v11 }
  0x23   : > { %428 = vperm.xlu0 %817, %v410_v12   ;;  %379 = vmatprep.mubr.f32.mxu0 %v898_v0 }
  0x24   : > { %433 = vperm.xlu1 %818, %v411_v13  }
  0x26   : > { %733 = vmatmul.mubr.msk.f32.gmra.mxu0 %vm285_vm1, %v257_v14 }
  0x27   : > { %438 = vperm.xlu0 %817, %v412_v15   ;;  %385 = vmatprep.mubr.f32.mxu0 %v898_v0 }
  0x28   : > { %443 = vperm.xlu1 %818, %v413_v16  }
  0x2a   : > { %734 = vmatmul.mubr.msk.f32.gmra.mxu0 %vm285_vm1, %v258_v17 }
  0x2b   : > { %448 = vperm.xlu0 %817, %v414_v18   ;;  %545 = vmatprep.mubr.f32.mxu0 %v898_v0 }
  0x2c   : > { %453 = vperm.xlu1 %818, %v415_v19  }
  0x92   : > { %v281_v24 = vpop.permute.xlu0 %280  ;;  %v271_v27 = vpop.permute.xlu1 %270 }
  0x96   : > { %v276_v29 = vpop.permute.xlu0 %275  ;;  %v266_v35 = vpop.permute.xlu1 %265 }
  0x9a   : > { %v419_v56 = vpop.permute.xlu0 %418 }
  0x9b   : > { %v424_v57 = vpop.permute.xlu1 %423 }
  0x9e   : > { %v429_v58 = vpop.permute.xlu0 %428 }
  0x9f   : > { %v434_v2 = vpop.permute.xlu1 %433 }
  0xa2   : > { %v439_v18 = vpop.permute.xlu0 %438 }
  0xde   : > { %v369_v20 = vpop.f32.mrf.mxu0 }
  0xdf   : > { %v370_v42 = vadd.f32 %v369_v20, %v266_v35 }
  0xe0   : > { %v371_v21 = vpop.f32.mrf.mxu0 }
  0xe1   : > { %v372_v40 = vadd.f32 %v371_v21, %v266_v35  ;;  %v392_v47 = vmax.f32 %v370_v42, 0.0 }
  0xe2   : > { %v375_v22 = vpop.f32.mrf.mxu0 }
  0xe3   : > { %v376_v38 = vadd.f32 %v375_v22, %v271_v27  ;;  %v393_v46 = vmax.f32 %v372_v40, 0.0 }
  0xe4   : > { %v377_v23 = vpop.f32.mrf.mxu0 }
  0xe5   : > { %v378_v36 = vadd.f32 %v377_v23, %v271_v27  ;;  %v394_v45 = vmax.f32 %v376_v38, 0.0 }
  0xe6   : > { %v381_v25 = vpop.f32.mrf.mxu0 }
  0xe7   : > { %v382_v34 = vadd.f32 %v381_v25, %v276_v29  ;;  %v395_v44 = vmax.f32 %v378_v36, 0.0 }
  0xe8   : > { %v383_v26 = vpop.f32.mrf.mxu0 }
  0xe9   : > { %v384_v32 = vadd.f32 %v383_v26, %v276_v29  ;;  %v396_v43 = vmax.f32 %v382_v34, 0.0  ;;  %v444_v26 = vpop.permute.xlu1 %443 }
  0xea   : > { %v387_v28 = vpop.f32.mrf.mxu0 }
  0xeb   : > { %v388_v30 = vadd.f32 %v387_v28, %v281_v24  ;;  %v397_v41 = vmax.f32 %v384_v32, 0.0 }
  0xec   : > { %v389_v31 = vpop.f32.mrf.mxu0 }
  0xed   : > { %v390_v33 = vadd.f32 %v389_v31, %v281_v24  ;;  %v398_v39 = vmax.f32 %v388_v30, 0.0  ;;  %v454_v40 = vpop.permute.xlu1 %453 }
  0xef   : > { %v399_v37 = vmax.f32 %v390_v33, 0.0  ;;  %v449_v33 = vpop.permute.xlu0 %448 }
  0xf1   : > { %505 = vmatprep.subr.mxu0 %v399_v37  ;;  %750 = vmatprep.subr.mxu1 %v399_v37 }
  0xf2   : > { %506 = vmatpush1.msra.mxu0 %v398_v39  ;;  %754 = vmatpush1.msra.mxu1 %v398_v39 }
  0xf3   : > { %507 = vmatprep.subr.mxu0 %v397_v41  ;;  %751 = vmatprep.subr.mxu1 %v397_v41 }
  0xf4   : > { %508 = vmatpush1.msra.mxu0 %v396_v43  ;;  %755 = vmatpush1.msra.mxu1 %v396_v43 }
  0xf5   : > { %509 = vmatprep.subr.mxu0 %v395_v44  ;;  %752 = vmatprep.subr.mxu1 %v395_v44 }
  0xf6   : > { %510 = vmatpush1.msra.mxu0 %v394_v45  ;;  %756 = vmatpush1.msra.mxu1 %v394_v45 }
  0xf7   : > { %511 = vmatprep.subr.mxu0 %v393_v46  ;;  %753 = vmatprep.subr.mxu1 %v393_v46 }
  0xf8   : > { %512 = vmatpush1.msra.mxu0 %v392_v47  ;;  %757 = vmatpush1.msra.mxu1 %v392_v47 }
  0xf9   : > { %735 = vmatmul.mubr.msk.f32.vlgmr.msra.gmra.mxu0 %vm456_vm2, %v400_v48  ;;  %737 = vmatmul.mubr.msk.f32.vlgmr.msra.gmra.mxu1 %vm456_vm2, %v402_v49 }
  0xfa   : > { %551 = vmatprep.mubr.f32.mxu0 %v898_v0  ;;  %563 = vmatprep.mubr.f32.mxu1 %v898_v0 }
  0xfd   : > { %736 = vmatmul.mubr.msk.f32.gmra.mxu0 %vm456_vm2, %v401_v50  ;;  %738 = vmatmul.mubr.msk.f32.gmra.mxu1 %vm456_vm2, %v403_v51 }
  0xfe   : > { %569 = vmatprep.mubr.f32.mxu1 %v898_v0 }
 0x101   : > { %739 = vmatmul.mubr.msk.f32.gmra.mxu1 %vm456_vm2, %v404_v52 }
 0x102   : > { %575 = vmatprep.mubr.f32.mxu1 %v898_v0 }
 0x105   : > { %740 = vmatmul.mubr.msk.f32.gmra.mxu1 %vm456_vm2, %v405_v53 }
 0x106   : > { %581 = vmatprep.mubr.f32.mxu1 %v898_v0 }
 0x109   : > { %741 = vmatmul.mubr.msk.f32.gmra.mxu1 %vm456_vm2, %v406_v54 }
 0x10a   : > { %587 = vmatprep.mubr.f32.mxu1 %v898_v0 }
 0x10d   : > { %742 = vmatmul.mubr.msk.f32.gmra.mxu1 %vm456_vm2, %v407_v55 }
 0x1b9   : > { %v547_v59 = vpop.f32.mrf.mxu0  ;;  %v559_v60 = vpop.f32.mrf.mxu1 }
 0x1ba   : > { %v548_v61 = vadd.f32 %v547_v59, %v419_v56  ;;  %v560_v62 = vadd.f32 %v559_v60, %v429_v58 }
 0x1bb   : > { %v549_v63 = vpop.f32.mrf.mxu0  ;;  %v561_v1 = vpop.f32.mrf.mxu1 }
 0x1bc   : > { %v594_v0 = vmax.f32 %v548_v61, 0.0  ;;  %v598_v3 = vmax.f32 %v560_v62, 0.0  ;;  %v550_v4 = vadd.f32 %v549_v63, %v419_v56  ;;  %v562_v5 = vadd.f32 %v561_v1, %v429_v58 }
 0x1bd   : > { %v553_v6 = vpop.f32.mrf.mxu0  ;;  %v565_v7 = vpop.f32.mrf.mxu1 }
 0x1be   : > { %610 = vst [vmem:[%s1092_s17] sm:$0xff] %v594_v0  ;;  %614 = vst [vmem:[%s1092_s17 + $0x20] sm:$0xff] %v598_v3  ;;  %v595_v8 = vmax.f32 %v550_v4, 0.0  ;;  %v599_v9 = vmax.f32 %v562_v5, 0.0  ;;  %v554_v10 = vadd.f32 %v553_v6, %v424_v57  ;;  %v566_v11 = vadd.f32 %v565_v7, %v434_v2 }
 0x1bf   : > { %v555_v12 = vpop.f32.mrf.mxu0  ;;  %v567_v13 = vpop.f32.mrf.mxu1 }
 0x1c0   : > { %611 = vst [vmem:[%s1092_s17 + $0x8] sm:$0xff] %v595_v8  ;;  %615 = vst [vmem:[%s1092_s17 + $0x28] sm:$0xff] %v599_v9  ;;  %v596_v14 = vmax.f32 %v554_v10, 0.0  ;;  %v600_v15 = vmax.f32 %v566_v11, 0.0  ;;  %v556_v16 = vadd.f32 %v555_v12, %v424_v57  ;;  %v568_v17 = vadd.f32 %v567_v13, %v434_v2 }
 0x1c1   : > { %v571_v19 = vpop.f32.mrf.mxu1 }
 0x1c2   : > { %612 = vst [vmem:[%s1092_s17 + $0x10] sm:$0xff] %v596_v14  ;;  %616 = vst [vmem:[%s1092_s17 + $0x30] sm:$0xff] %v600_v15  ;;  %v597_v20 = vmax.f32 %v556_v16, 0.0  ;;  %v601_v21 = vmax.f32 %v568_v17, 0.0  ;;  %v572_v22 = vadd.f32 %v571_v19, %v439_v18 }
 0x1c3   : > { %v573_v23 = vpop.f32.mrf.mxu1 }
 0x1c4   : > { %613 = vst [vmem:[%s1092_s17 + $0x18] sm:$0xff] %v597_v20  ;;  %617 = vst [vmem:[%s1092_s17 + $0x38] sm:$0xff] %v601_v21  ;;  %v602_v24 = vmax.f32 %v572_v22, 0.0  ;;  %v574_v25 = vadd.f32 %v573_v23, %v439_v18 }
 0x1c5   : > { %v577_v27 = vpop.f32.mrf.mxu1 }
 0x1c6   : > { %618 = vst [vmem:[%s1092_s17 + $0x40] sm:$0xff] %v602_v24  ;;  %v603_v28 = vmax.f32 %v574_v25, 0.0  ;;  %v578_v29 = vadd.f32 %v577_v27, %v444_v26 }
 0x1c7   : > { %v579_v30 = vpop.f32.mrf.mxu1 }
 0x1c8   : > { %619 = vst [vmem:[%s1092_s17 + $0x48] sm:$0xff] %v603_v28  ;;  %v604_v31 = vmax.f32 %v578_v29, 0.0  ;;  %v580_v32 = vadd.f32 %v579_v30, %v444_v26 }
 0x1c9   : > { %v583_v34 = vpop.f32.mrf.mxu1 }
 0x1ca   : > { %620 = vst [vmem:[%s1092_s17 + $0x50] sm:$0xff] %v604_v31  ;;  %v605_v35 = vmax.f32 %v580_v32, 0.0  ;;  %v584_v36 = vadd.f32 %v583_v34, %v449_v33 }
 0x1cb   : > { %v585_v37 = vpop.f32.mrf.mxu1 }
 0x1cc   : > { %621 = vst [vmem:[%s1092_s17 + $0x58] sm:$0xff] %v605_v35  ;;  %v606_v38 = vmax.f32 %v584_v36, 0.0  ;;  %v586_v39 = vadd.f32 %v585_v37, %v449_v33 }
 0x1cd   : > { %v589_v41 = vpop.f32.mrf.mxu1 }
 0x1ce   : > { %622 = vst [vmem:[%s1092_s17 + $0x60] sm:$0xff] %v606_v38  ;;  %v607_v42 = vmax.f32 %v586_v39, 0.0  ;;  %v590_v43 = vadd.f32 %v589_v41, %v454_v40 }
 0x1cf   : > { %v591_v44 = vpop.f32.mrf.mxu1 }
 0x1d0   : > { %623 = vst [vmem:[%s1092_s17 + $0x68] sm:$0xff] %v607_v42  ;;  %v608_v45 = vmax.f32 %v590_v43, 0.0  ;;  %v592_v46 = vadd.f32 %v591_v44, %v454_v40 }
 0x1d2   : > { %624 = vst [vmem:[%s1092_s17 + $0x70] sm:$0xff] %v608_v45  ;;  %v609_v47 = vmax.f32 %v592_v46, 0.0 }
 0x1d4   : > { %625 = vst [vmem:[%s1092_s17 + $0x78] sm:$0xff] %v609_v47 }
 0x1d5   : > { %833 = shalt.err (!%p830_p5)
}
 0x1d6   : > { %s834_s12 = scalar_lea.hbm %s1113_s7, 2048  ;;  %s838_s15 = scalar_lea.hbm %s1171_s5, 4096 }
 0x1d7   : > { %p835_p6 = scmp.ne.s32.totalorder %s1113_s7, %s834_s12  ;;  %p839_p10 = scmp.lt.s32.totalorder %s1113_s7, %s1171_s5 }
 0x1d8   : > { %p840_p11 = scmp.lt.s32.totalorder %s838_s15, %s834_s12 }
 0x1d9   : > { %p836_p7 = pnand %p835_p6, %p973_p4 }
 0x1da   : > { %p841_p12 = por %p840_p11, %p839_p10 }
 0x1db   : > { %p837_p9 = pneg %p836_p7 }
 0x1dd   : > { %p842_p13 = pnand %p841_p12, %p837_p9 }
 0x1df   : > { %845 = shalt.err (!%p842_p13)
}
 0x1e0   : > { %s901_s24 = smov 256   ;;  %s902_s27 = smov 16  }
 0x1e1   : > { %758 = dma.vmem_to_hbm [thread:$0]  (%p973_p4), %s1115_s25, 2048, %s1113_s7, %s1121_s21, %s901_s24, %s901_s24, %s902_s27  }
 0x1e2 PF: > { %p764_p0 = scmp.ge.s32.totalorder %s896_s23, 2  ;;  %s657_s29 = sand.u32 1, %s876_s18  }
 0x1e3   : > { %s658_s8 = scalar_lea.sflag [#allocation3], %s657_s29 }
 0x1e4   : > { %p761_p1 = pnand %p764_p0, %p980_p8 }
 0x1e6   : > { %p762_p2 = pneg %p761_p1 }
 0x1e8   : > { %871 = dma.done.wait (%p762_p2), %s658_s8, 2048  }
 0x1e9   : > { %873 = vsyncadd (%p762_p2), %s658_s8, 4294965248  ;;  %s18_s23 = sadd.s32 1, %s896_s23   ;;  %s1174_s18 = smov %s880_s19 }
 0x1ea   : > { %p15_p3 = scmp.ge.s32.totalorder %s18_s23, 4   ;;  %s1175_s19 = smov %s884_s20 }
 0x1eb   : > { %s1176_s20 = smov %s986_s6  ;;  %s1177_s21 = smov %s892_s22 }
 0x1ec   : > { %s1178_s22 = smov %s1180_s26  ;;  %17 = sbr.rel (!%p15_p3) target bundleno = 4 (0x4), region = 75 }
 0x1f1   :  { %663 = vsyncpa [#allocation3], 1 }
 0x1f2   :  { %665 = vsyncpa [#allocation3 + $0x1], 1 }

</bundles_post_ra>
